<compile_context>
chip_gen: v7x
topology: tpu7x:2x2x1
jax: 0.10.0
libtpu: 0.0.40
codegen_flags: <defaults>
</compile_context>

<pallas_src>
import functools
import math

import jax
import jax.numpy as jnp
from jax.experimental import pallas as pl
from jax.experimental.pallas import tpu as pltpu


def add_beta_kernel(x_ref, beta_ref, o_ref):
    # x_ref/o_ref: (bm, bn) tile; beta_ref: (1, bn) -- broadcasts over sublanes.
    o_ref[...] = x_ref[...] + beta_ref[...]


def _sublane_multiple(dtype) -> int:
    # Packed sub-32-bit dtypes need more rows per vreg: f32 -> 8, bf16 -> 16,
    # int8/fp8 -> 32.
    itemsize = jnp.dtype(dtype).itemsize
    return {4: 8, 2: 16, 1: 32}.get(itemsize, 8)


def _hw_params() -> tuple[int, int, int]:
    """Return (target block bytes, row cap, scoped-VMEM budget bytes)."""
    kind = ""
    try:
        kind = jax.devices()[0].device_kind.lower()
    except Exception:
        pass

    # Physical VMEM (v5e/v6e: 128 MiB, v7x: 64 MiB); fall back conservatively.
    vmem_physical = 64 << 20 if "v7" in kind else 128 << 20
    try:
        vmem_physical = int(pltpu.get_tpu_info().vmem_capacity_bytes)
    except Exception:
        pass

    if "v7" in kind:      # ~3.2 TB/s HBM: need 2-4 MiB blocks to amortize step overhead
        target_bytes, bm_cap = 4 << 20, 8192
    elif "v6" in kind:    # ~1.4 TB/s
        target_bytes, bm_cap = 2 << 20, 4096
    else:                 # v5e (~0.8 TB/s) and unknown
        target_bytes, bm_cap = 1 << 20, 2048

    # Keep 2x(in+out) double buffers (~4 blocks) within ~half the scoped
    # budget, which itself stays within ~half the physical VMEM.
    scoped_budget = vmem_physical // 2
    target_bytes = min(target_bytes, scoped_budget // 8)
    return target_bytes, bm_cap, scoped_budget


def _pick_tiles(B: int, F: int, dtype, target_bytes: int, bm_cap: int) -> tuple[int, int]:
    """Row/feature block sizes for the (B, F) 2-D view."""
    itemsize = jnp.dtype(dtype).itemsize
    sub = _sublane_multiple(dtype)

    # Tiny array: one full block -- pipelining cannot pay for itself.
    if B * F * itemsize <= (1 << 20):
        return B, F

    # Feature tile: prefer full-width rows (fully contiguous DMA, resident
    # beta, 1-D grid). Only split the feature axis when even a minimal
    # sublane-multiple slab at full width overruns the block budget (and F is
    # 128-aligned so chunks stay lane-dense).
    if F % 128 != 0 or sub * F * itemsize <= target_bytes:
        bn = F
    else:
        bn = 1024

    # Row tile: fill the block budget, rounded to the sublane packing multiple
    # so stores stay unmasked vst.
    bm = max(sub, (target_bytes // (bn * itemsize)) // sub * sub)
    bm = min(bm, bm_cap)

    if bm >= B:
        # Never collapse a >1 MiB array to a single block: keep >= 2 row
        # blocks so read/compute/write overlap and both v7x TensorCores get
        # work (partial last block is fine).
        if B > sub:
            bm = ((pl.cdiv(B, 2) + sub - 1) // sub) * sub
        else:
            bm = B
    return bm, bn


def add_beta(x: jax.Array, beta: jax.Array, *, bm: int | None = None,
             bn: int | None = None, donate: bool = False) -> jax.Array:
    """x: (..., F), beta: (F,). Returns x + beta broadcast over leading dims."""
    F = beta.shape[-1]
    assert beta.shape == (F,), f"beta must be 1-D of size {F}"
    assert x.shape[-1] == F, "trailing dim of x must match beta"
    orig_shape = x.shape

    # dtype policy: follow PyTorch type promotion (e.g. bf16 x + f32 beta -> f32).
    out_dtype = jnp.result_type(x.dtype, beta.dtype)
    x = x.astype(out_dtype)
    beta = beta.astype(out_dtype)
    itemsize = jnp.dtype(out_dtype).itemsize
    sub = _sublane_multiple(out_dtype)

    target_bytes, bm_cap, scoped_budget = _hw_params()

    # Default 2-D view: (rows, F).
    x2d = x.reshape(-1, F)
    beta_row = beta.reshape(1, F)
    Fk = F

    # Lane-dense repack when F is not 128-aligned: flatten into rows of
    # lcm(F, 128) elements with beta tiled once in the wrapper. Avoids masked
    # vst.msk partial stores / short DMA rows (the biggest mem-bound lever).
    if F % 128 != 0:
        L = (F * 128) // math.gcd(F, 128)
        n_rows0 = x2d.shape[0]
        if (n_rows0 * F) % L == 0 and sub * L * itemsize <= target_bytes:
            reps = L // F
            x2d = x.reshape(-1, L)
            beta_row = jnp.tile(beta, reps).reshape(1, L)
            Fk = L
        # else: fall back to bn = F (correct, just masked stores).

    B = x2d.shape[0]

    auto_bm, auto_bn = _pick_tiles(B, Fk, out_dtype, target_bytes, bm_cap)
    bm = auto_bm if bm is None else max(1, min(bm, B))
    bn = auto_bn if bn is None else max(1, min(bn, Fk))

    block_bytes = bm * bn * itemsize
    # Double-buffered x + out blocks, plus (tiny) double-buffered beta row.
    vmem_needed = 4 * block_bytes + 4 * bn * itemsize
    vmem_limit = int(min(scoped_budget, max(2 * vmem_needed, 16 << 20)))

    cost = pl.CostEstimate(
        flops=B * Fk,
        transcendentals=0,
        bytes_accessed=2 * B * Fk * itemsize + Fk * itemsize,
    )

    if bn == Fk:
        # 1-D grid over row blocks; beta block is constant -> genuinely resident.
        grid = (pl.cdiv(B, bm),)
        in_specs = [
            pl.BlockSpec((bm, bn), lambda i: (i, 0)),
            pl.BlockSpec((1, bn), lambda i: (0, 0)),
        ]
        out_specs = pl.BlockSpec((bm, bn), lambda i: (i, 0))
        dims = ("parallel",)
    else:
        # Feature axis is the OUTER (slow) grid dim so beta stays resident
        # across the inner row axis.
        grid = (pl.cdiv(Fk, bn), pl.cdiv(B, bm))
        in_specs = [
            pl.BlockSpec((bm, bn), lambda j, i: (i, j)),
            pl.BlockSpec((1, bn), lambda j, i: (0, j)),
        ]
        out_specs = pl.BlockSpec((bm, bn), lambda j, i: (i, j))
        dims = ("parallel", "parallel")

    out = pl.pallas_call(
        add_beta_kernel,
        out_shape=jax.ShapeDtypeStruct((B, Fk), out_dtype),
        grid_spec=pltpu.PrefetchScalarGridSpec(
            num_scalar_prefetch=0,
            grid=grid,
            in_specs=in_specs,
            out_specs=out_specs,
        ),
        compiler_params=pltpu.CompilerParams(
            dimension_semantics=dims,
            vmem_limit_bytes=vmem_limit,
        ),
        cost_estimate=cost,
        input_output_aliases={0: 0} if donate else {},
    )(x2d, beta_row)

    return out.reshape(orig_shape)


if __name__ == "__main__":
    key = jax.random.PRNGKey(0)
    kx, kb, kx2, kx3, kx4 = jax.random.split(key, 5)

    # Ladder-net usage: dense activations (batch, features), AddBeta(size=features).
    B, F = 8, 128
    x = jax.random.normal(kx, (B, F), dtype=jnp.float32)
    beta0 = jnp.zeros((F,), dtype=jnp.float32)   # nn.Parameter(torch.zeros(size))
    out = jax.block_until_ready(add_beta(x, beta0))
    assert out.shape == (B, F)
    assert jnp.allclose(out, x + beta0), "mismatch vs reference (zero beta)"

    # Non-zero ("trained") beta, ragged batch, forced small row tile so the
    # multi-block path with a partial last block is exercised.
    beta = jax.random.normal(kb, (F,), dtype=jnp.float32)
    x2 = jax.random.normal(kx2, (20, F), dtype=jnp.float32)
    out2 = jax.block_until_ready(add_beta(x2, beta, bm=8))
    assert jnp.allclose(out2, x2 + beta), "mismatch vs reference (ragged batch)"

    # Non-128-aligned feature dim -> lane-dense repack path (rows of lcm(F, 128)).
    F3 = 96
    x3 = jax.random.normal(kx3, (64, F3), dtype=jnp.float32)
    beta3 = jax.random.normal(kb, (F3,), dtype=jnp.float32)
    out3 = jax.block_until_ready(add_beta(x3, beta3))
    assert jnp.allclose(out3, x3 + beta3), "mismatch vs reference (repack path)"

    # Buffer-donating variant: output reuses x's HBM allocation.
    x4 = jax.random.normal(kx4, (64, F), dtype=jnp.float32)
    expected4 = x4 + beta
    donating = jax.jit(functools.partial(add_beta, donate=True), donate_argnums=(0,))
    out4 = jax.block_until_ready(donating(x4, beta))
    assert jnp.allclose(out4, expected4), "mismatch vs reference (donated buffer)"

    print("KERNEL_OK")
</pallas_src>

<mosaic_0001>
module attributes {stable_mosaic.version = 11 : i64} {
  func.func @add_beta_kernel(%arg0: i32, %arg1: memref<8x128xf32, #tpu.memory_space<vmem>>, %arg2: memref<1x128xf32, #tpu.memory_space<vmem>>, %arg3: memref<8x128xf32, #tpu.memory_space<vmem>>) attributes {dimension_semantics = [#tpu.dimension_semantics<parallel>], iteration_bounds = array<i64: 1>, scalar_prefetch = 0 : i64, scratch_operands = 0 : i64, tpu.core_type = #tpu.core_type<tc>, window_params = [{transform_indices = @transform_0, window_bounds = array<i64: 8, 128>}, {pipeline_mode = #tpu.pipeline_mode<synchronous>, transform_indices = @transform_1, window_bounds = array<i64: 1, 128>}, {transform_indices = @transform_2, window_bounds = array<i64: 8, 128>}]} {
    %c0 = arith.constant 0 : index
    %c0_0 = arith.constant 0 : index
    %0 = vector.load %arg1[%c0, %c0_0] : memref<8x128xf32, #tpu.memory_space<vmem>>, vector<8x128xf32>
    %c0_1 = arith.constant 0 : index
    %c0_2 = arith.constant 0 : index
    %1 = vector.load %arg2[%c0_1, %c0_2] : memref<1x128xf32, #tpu.memory_space<vmem>>, vector<1x128xf32>
    %2 = vector.broadcast %1 : vector<1x128xf32> to vector<8x128xf32>
    %3 = arith.addf %0, %2 : vector<8x128xf32>
    %c0_3 = arith.constant 0 : index
    %c0_4 = arith.constant 0 : index
    %4 = vector.load %arg3[%c0_3, %c0_4] : memref<8x128xf32, #tpu.memory_space<vmem>>, vector<8x128xf32>
    tpu.vector_store %arg3[%c0_3, %c0_4], %3 {strides = array<i32>} : memref<8x128xf32, #tpu.memory_space<vmem>>, vector<8x128xf32>,
    return
  }
  func.func @transform_0(%arg0: i32) -> (i32, i32) {
    %c0_i32 = arith.constant 0 : i32
    %c0_i32_0 = arith.constant 0 : i32
    return %arg0, %c0_i32 : i32, i32
  }
  func.func @transform_1(%arg0: i32) -> (i32, i32) {
    %c0_i32 = arith.constant 0 : i32
    %c0_i32_0 = arith.constant 0 : i32
    %c0_i32_1 = arith.constant 0 : i32
    return %c0_i32, %c0_i32_0 : i32, i32
  }
  func.func @transform_2(%arg0: i32) -> (i32, i32) {
    %c0_i32 = arith.constant 0 : i32
    %c0_i32_0 = arith.constant 0 : i32
    return %arg0, %c0_i32 : i32, i32
  }
}

</mosaic_0001>

<bundles_post_ra>
// kernel: tpu_custom_call.1
= control target key start
LH: loop header
LB: loop body
LE: loop exit
PB: predicated region body
PF: predicated region fallthrough
CT: control target
= control target key end

     0   :  { %7 = vsyncpa [#allocation3], 0  ;;  %s144_s0 = inlined_call_operand.hbm [shape: f32[8,128], index: 0, kind: input, shape index: {}]   ;;  %s145_s1 = inlined_call_operand.vmem [shape: f32[1,128], index: 1, kind: input, shape index: {}]   ;;  %s146_s2 = inlined_call_operand.hbm [shape: f32[8,128], index: 2, kind: output, shape index: {}]  }
   0x1   :  { %8 = vsyncpa [#allocation4], 0  ;;  %s100_s9 = smov [#allocation2]   ;;  %s52_s13 = scalar_lea.hbm %s144_s0, 128 }
   0x2   :  { %s15_s10 = sshll.u32 %s100_s9, 4  ;;  %p53_p0 = scmp.ne.s32.totalorder %s144_s0, %s52_s13  ;;  %s16_s10 = int_to_ptr.vmem [resolvable:$true] %s15_s10 }
   0x3   :  { %p56_p1 = scmp.lt.u32.totalorder %s52_s13, %s144_s0 }
   0x5   :  { %p58_p2 = pnand %p56_p1, %p53_p0 }
   0x7   :  { %61 = shalt.err (!%p58_p2)
}
   0x8   :  { %s62_s18 = scalar_lea.vmem %s16_s10, 128  ;;  %p67_p4 = scmp.lt.s32.totalorder %s16_s10, %s16_s10 }
   0x9   :  { %p63_p3 = scmp.ne.s32.totalorder %s16_s10, %s62_s18  ;;  %p68_p5 = scmp.lt.s32.totalorder %s62_s18, %s62_s18 }
   0xb   :  { %p69_p6 = por %p68_p5, %p67_p4 }
   0xd   :  { %p70_p7 = pnand %p69_p6, %p63_p3 }
   0xf   :  { %73 = shalt.err (!%p70_p7)
}
  0x10   :  { %18 = dma.hbm_to_vmem [thread:$0]  %s144_s0, 128, %s16_s10, [#allocation3]  }
  0x11   :  { %96 = dma.done.wait [#allocation3], 128  }
  0x12   :  { %97 = vsyncadd [#allocation3], 4294967168  ;;  %s101_s21 = smov [#allocation5]   ;;  %v24_v0 = vld [vmem:[#allocation2] sm:$0xff] }
  0x13   :  { %s40_s22 = sshll.u32 %s101_s21, 4  ;;  %v49_v1 = vld [vmem:[%s145_s1] ss:$0 sm:$0xff]  ;;  %s41_s22 = int_to_ptr.vmem [resolvable:$true] %s40_s22 }
  0x14   :  { %v32_v2 = vadd.f32 %v49_v1, %v24_v0  ;;  %s74_s25 = scalar_lea.vmem %s41_s22, 128  ;;  %p79_p9 = scmp.lt.s32.totalorder %s41_s22, %s41_s22 }
  0x15   :  { %p75_p8 = scmp.ne.s32.totalorder %s41_s22, %s74_s25  ;;  %p80_p10 = scmp.lt.s32.totalorder %s74_s25, %s74_s25 }
  0x16   :  { %33 = vst [vmem:[#allocation5] sm:$0xff] %v32_v2 }
  0x17   :  { %p81_p11 = por %p80_p10, %p79_p9 }
  0x19   :  { %p82_p12 = pnand %p81_p11, %p75_p8 }
  0x1b   :  { %85 = shalt.err (!%p82_p12)
}
  0x1c   :  { %s86_s27 = scalar_lea.hbm %s146_s2, 128 }
  0x1d   :  { %p87_p13 = scmp.ne.s32.totalorder %s146_s2, %s86_s27  ;;  %p90_p0 = scmp.lt.u32.totalorder %s86_s27, %s146_s2 }
  0x1f   :  { %p92_p1 = pnand %p90_p0, %p87_p13 }
  0x21   :  { %95 = shalt.err (!%p92_p1)
}
  0x22   :  { %43 = dma.vmem_to_hbm [thread:$0]  %s41_s22, 128, %s146_s2, [#allocation4]  }
  0x23   :  { %98 = dma.done.wait [#allocation4], 128  }
  0x24   :  { %99 = vsyncadd [#allocation4], 4294967168 }
  0x25   :  { %47 = vsyncpa [#allocation3], 1 }
  0x26   :  { %48 = vsyncpa [#allocation4], 1 }

</bundles_post_ra>
